<compile_context>
chip_gen: v5e
topology: v5e:2x2
jax: 0.10.0
libtpu: 0.0.40
codegen_flags: <defaults>
</compile_context>

<pallas_src>
import jax
import jax.numpy as jnp
from jax.experimental import pallas as pl
from jax.experimental.pallas import tpu as pltpu

# ---- config (small, deterministic) -----------------------------------------
SEQ_LEN = 16          # configs.seq_len
D_MODEL = 32          # configs.d_model  (== pred_len)
MOVING_AVG = 5        # configs.moving_avg (odd, as in DLinear/Autoformer configs)
ENC_IN = 1


# -----------------------------------------------------------------------------
# Weight folding (done once, outside the hot path)
# -----------------------------------------------------------------------------
def fold_shared_extractor_weights(w_seasonal, w_trend, *, seq_len, moving_avg):
    """Fold replicate-pad moving-average decomposition + both Linear layers into one (L, P) weight.

    w_seasonal, w_trend: (d_model, seq_len) — PyTorch nn.Linear weight layout.
    Returns W_final of shape (seq_len, d_model) such that out = x @ W_final.
    """
    # PyTorch series_decomp / AvgPool1d with replicate padding only matches this
    # construction for odd kernel sizes (even sizes change the output length).
    assert moving_avg % 2 == 1, "moving_avg must be odd to match series_decomp semantics"
    pad = (moving_avg - 1) // 2

    # M[t, s] = (1/k) * (# of taps in window [t-pad, t+pad] that clamp to index s)
    t = jnp.arange(seq_len)
    taps = jnp.arange(-pad, pad + 1)
    idx = jnp.clip(t[:, None] + taps[None, :], 0, seq_len - 1)              # (L, k)
    M = jax.nn.one_hot(idx, seq_len, dtype=jnp.float32).mean(axis=1)        # (L, L)

    eye = jnp.eye(seq_len, dtype=jnp.float32)
    ws = w_seasonal.astype(jnp.float32).T                                   # (L, P)
    wt = w_trend.astype(jnp.float32).T                                      # (L, P)
    # out = (x @ (I-M).T) @ ws + (x @ M.T) @ wt = x @ [(I-M).T @ ws + M.T @ wt]
    w_final = (eye - M).T @ ws + M.T @ wt                                   # (L, P)
    return w_final


# -----------------------------------------------------------------------------
# Pallas kernel: one MXU matmul per batch tile
# -----------------------------------------------------------------------------
def _shared_extractor_kernel(x_ref, w_ref, out_ref):
    """x_ref: (TB, L)   w_ref: (L, P)   out_ref: (TB, P)."""
    out_ref[...] = jnp.dot(
        x_ref[...], w_ref[...], preferred_element_type=jnp.float32
    ).astype(out_ref.dtype)


def _round_up(n, m):
    return ((n + m - 1) // m) * m


def shared_extractor(x_enc, w_final):
    """x_enc: (B, seq_len, 1) float32 ; w_final: (seq_len, d_model) folded weight."""
    B, L, C = x_enc.shape
    P = w_final.shape[1]
    assert C == ENC_IN
    assert w_final.shape[0] == L

    if B == 0:  # x_enc.new_empty((0, pred_len, enc_in))
        return jnp.empty((0, P, C), dtype=x_enc.dtype)

    x = x_enc[..., 0]                                      # (B, L)  squeeze single channel

    # Batch tile: f32 sublane-aligned (multiple of 8), capped so VMEM stays tiny even for
    # huge batches.  Pad ragged batches up to a multiple of the tile (cheap, sliced below).
    tb = min(512, _round_up(B, 8))
    Bp = _round_up(B, tb)
    if Bp != B:
        x = jnp.pad(x, ((0, Bp - B), (0, 0)))

    grid = (Bp // tb,)

    out = pl.pallas_call(
        _shared_extractor_kernel,
        out_shape=jax.ShapeDtypeStruct((Bp, P), x_enc.dtype),
        grid=grid,
        in_specs=[
            pl.BlockSpec((tb, L), lambda i: (i, 0)),       # batch-tiled input
            pl.BlockSpec((L, P), lambda i: (0, 0)),        # fused weight, resident across grid
        ],
        out_specs=pl.BlockSpec((tb, P), lambda i: (i, 0)),
        compiler_params=pltpu.CompilerParams(
            dimension_semantics=("parallel",),             # batch tiles are independent
        ),
    )(x, w_final)

    if Bp != B:
        out = out[:B]

    # encoded = (...).permute(0, 2, 1) -> (B, d_model, enc_in); [:, -pred_len:, :] is a no-op
    # (pred_len == d_model).
    return out[:, :, None]


# -----------------------------------------------------------------------------
# Plain-JAX reference mirroring the PyTorch forward (unfused), for a sanity check
# -----------------------------------------------------------------------------
def _reference(x_enc, w_seasonal, w_trend, moving_avg=MOVING_AVG):
    pad = (moving_avg - 1) // 2
    x = x_enc[..., 0]
    xpad = jnp.concatenate(
        [jnp.repeat(x[:, :1], pad, axis=1), x, jnp.repeat(x[:, -1:], pad, axis=1)], axis=1
    )
    windows = jnp.stack([xpad[:, j:j + x.shape[1]] for j in range(moving_avg)], axis=0)
    trend = windows.mean(axis=0)
    seasonal = x - trend
    out = seasonal @ w_seasonal.T + trend @ w_trend.T
    return out[:, :, None]


if __name__ == "__main__":
    key = jax.random.PRNGKey(0)
    B = 2
    x_enc = jax.random.normal(key, (B, SEQ_LEN, ENC_IN), dtype=jnp.float32)

    # nn.init.constant_(weight, 1.0 / seq_len), weight shape (d_model, seq_len), no bias
    w_seasonal = jnp.full((D_MODEL, SEQ_LEN), 1.0 / SEQ_LEN, dtype=jnp.float32)
    w_trend = jnp.full((D_MODEL, SEQ_LEN), 1.0 / SEQ_LEN, dtype=jnp.float32)

    # Fold decomposition + both projections into a single (L, P) weight — done once.
    w_final = fold_shared_extractor_weights(
        w_seasonal, w_trend, seq_len=SEQ_LEN, moving_avg=MOVING_AVG
    )

    out = shared_extractor(x_enc, w_final)
    out = jax.block_until_ready(out)

    ref = _reference(x_enc, w_seasonal, w_trend)
    assert out.shape == (B, D_MODEL, ENC_IN), out.shape
    assert jnp.allclose(out, ref, atol=1e-5, rtol=1e-5)

    # ragged-batch path exercises the pad-and-slice wrapper
    B2 = 10
    x2 = jax.random.normal(jax.random.PRNGKey(1), (B2, SEQ_LEN, ENC_IN), dtype=jnp.float32)
    out2 = jax.block_until_ready(shared_extractor(x2, w_final))
    assert out2.shape == (B2, D_MODEL, ENC_IN)
    assert jnp.allclose(out2, _reference(x2, w_seasonal, w_trend), atol=1e-5, rtol=1e-5)

    # empty-batch path (matches x_enc.new_empty((0, pred_len, enc_in)))
    empty = shared_extractor(jnp.zeros((0, SEQ_LEN, ENC_IN), jnp.float32), w_final)
    assert empty.shape == (0, D_MODEL, ENC_IN)

    print("KERNEL_OK")
</pallas_src>

<mosaic_0001>
module attributes {stable_mosaic.version = 11 : i64} {
  func.func @_shared_extractor_kernel(%arg0: i32, %arg1: memref<8x16xf32, #tpu.memory_space<vmem>>, %arg2: memref<16x32xf32, #tpu.memory_space<vmem>>, %arg3: memref<8x32xf32, #tpu.memory_space<vmem>>) attributes {dimension_semantics = [#tpu.dimension_semantics<parallel>], iteration_bounds = array<i64: 1>, scalar_prefetch = 0 : i64, scratch_operands = 0 : i64, tpu.core_type = #tpu.core_type<tc>, window_params = [{transform_indices = @transform_0, window_bounds = array<i64: 8, 16>}, {pipeline_mode = #tpu.pipeline_mode<synchronous>, transform_indices = @transform_1, window_bounds = array<i64: 16, 32>}, {transform_indices = @transform_2, window_bounds = array<i64: 8, 32>}]} {
    %c0 = arith.constant 0 : index
    %c0_0 = arith.constant 0 : index
    %0 = vector.load %arg1[%c0, %c0_0] : memref<8x16xf32, #tpu.memory_space<vmem>>, vector<8x16xf32>
    %c0_1 = arith.constant 0 : index
    %c0_2 = arith.constant 0 : index
    %1 = vector.load %arg2[%c0_1, %c0_2] : memref<16x32xf32, #tpu.memory_space<vmem>>, vector<16x32xf32>
    %cst = arith.constant dense<0.000000e+00> : vector<8x32xf32>
    %2 = tpu.matmul %0, %1, %cst {dimension_numbers = #tpu.dot_dimension_numbers<[1], [0], [0], [1], [0, 0, 1, 1], [], []>} : vector<8x16xf32>, vector<16x32xf32>, vector<8x32xf32> -> vector<8x32xf32>
    %c0_3 = arith.constant 0 : index
    %c0_4 = arith.constant 0 : index
    %3 = vector.load %arg3[%c0_3, %c0_4] : memref<8x32xf32, #tpu.memory_space<vmem>>, vector<8x32xf32>
    tpu.vector_store %arg3[%c0_3, %c0_4], %2 {strides = array<i32>} : memref<8x32xf32, #tpu.memory_space<vmem>>, vector<8x32xf32>,
    return
  }
  func.func @transform_0(%arg0: i32) -> (i32, i32) {
    %c0_i32 = arith.constant 0 : i32
    %c0_i32_0 = arith.constant 0 : i32
    return %arg0, %c0_i32 : i32, i32
  }
  func.func @transform_1(%arg0: i32) -> (i32, i32) {
    %c0_i32 = arith.constant 0 : i32
    %c0_i32_0 = arith.constant 0 : i32
    %c0_i32_1 = arith.constant 0 : i32
    return %c0_i32, %c0_i32_0 : i32, i32
  }
  func.func @transform_2(%arg0: i32) -> (i32, i32) {
    %c0_i32 = arith.constant 0 : i32
    %c0_i32_0 = arith.constant 0 : i32
    return %arg0, %c0_i32 : i32, i32
  }
}

</mosaic_0001>

<bundles_post_ra>
// kernel: tpu_custom_call.1
= control target key start
LH: loop header
LB: loop body
LE: loop exit
PB: predicated region body
PF: predicated region fallthrough
CT: control target
= control target key end

     0   :  { %7 = vsyncpa [#allocation3], 0  ;;  %s202_s0 = inlined_call_operand.hbm [shape: f32[8,16], index: 0, kind: input, shape index: {}]   ;;  %s203_s1 = inlined_call_operand.hbm [shape: f32[16,32], index: 1, kind: input, shape index: {}]   ;;  %s204_s2 = inlined_call_operand.hbm [shape: f32[8,32], index: 2, kind: output, shape index: {}]  }
   0x1   :  { %8 = vsyncpa [#allocation6], 0 }
   0x2   :  { %9 = vsyncpa [#allocation4], 0  ;;  %s15_s11 = sshll.u32 %s202_s0, 4  ;;  %s173_s12 = smov [#allocation2]   ;;  %s16_s11 = int_to_ptr.hbm [resolvable:$true] %s15_s11 }
   0x3   :  { %s17_s13 = sshll.u32 %s173_s12, 4  ;;  %s25_s16 = sshll.u32 %s203_s1, 4  ;;  %s18_s13 = int_to_ptr.vmem [resolvable:$true] %s17_s13  ;;  %s26_s16 = int_to_ptr.hbm [resolvable:$true] %s25_s16 }
   0x4   :  { %20 = dma.hbm_to_vmem [thread:$0]  %s16_s11, 128, %s18_s13, [#allocation3]  }
   0x5   :  { %s174_s17 = smov [#allocation5]   ;;  %s175_s19 = smov 128  }
   0x6   :  { %s27_s18 = sshll.u32 %s174_s17, 4  ;;  %s176_s20 = smov 8   ;;  %s28_s18 = int_to_ptr.vmem [resolvable:$true] %s27_s18 }
   0x7   :  { %33 = dma.hbm_to_vmem [thread:$0]  %s26_s16, 256, %s28_s18, [#allocation6], %s175_s19, %s175_s19, %s176_s20  }
   0x8   :  { %167 = dma.done.wait [#allocation3], 128  }
   0x9   :  { %168 = vsyncadd [#allocation3], 4294967168 }
   0xa   :  { %169 = dma.done.wait [#allocation6], 256  }
   0xb   :  { %170 = vsyncadd [#allocation6], 4294967040  ;;  %v44_v0 = vld [vmem:[#allocation5 + $0x8] sm:$0xff]  ;;  %v43_v1 = vld [vmem:[#allocation5] sm:$0xff]  ;;  %vm45_vm0 = vcmask 130048   ;;  %s177_s0 = smov [#allocation7]  }
   0xc   :  { %63 = vmatpush.msra.mxu0 %v44_v0  ;;  %v42_v2 = vld [vmem:[#allocation2] sm:$0xff]  ;;  %s76_s1 = sshll.u32 %s177_s0, 4  ;;  %s78_s23 = sshll.u32 %s204_s2, 4  ;;  %vm69_vm1 = vcmask 261120   ;;  %s77_s1 = int_to_ptr.vmem [resolvable:$true] %s76_s1  ;;  %s79_s23 = int_to_ptr.hbm [resolvable:$true] %s78_s23 }
   0xe   :  { %64 = vmatpush.msra.mxu0 %v43_v1 }
   0xf   :  { %89 = vmatmul.msk.f32.vlgmr.msra.gmra.mxu0 %vm45_vm0, %v42_v2 }
  0x8c   :  { %v66_v3 = vpop.f32.mrf.mxu0 }
  0x8d   :  { %70 = vst.msk [vmem:[#allocation7] sm:$0xff] %vm69_vm1, %v66_v3 }
  0x8e   :  { %81 = dma.vmem_to_hbm [thread:$0]  %s77_s1, 128, %s79_s23, [#allocation4]  }
  0x8f   :  { %171 = dma.done.wait [#allocation4], 128  }
  0x90   :  { %172 = vsyncadd [#allocation4], 4294967168 }
  0x91   :  { %86 = vsyncpa [#allocation3], 1 }
  0x92   :  { %87 = vsyncpa [#allocation6], 1 }
  0x93   :  { %88 = vsyncpa [#allocation4], 1 }

</bundles_post_ra>
